<compile_context>
chip_gen: v7x
topology: tpu7x:2x2x1
jax: 0.10.0
libtpu: 0.0.40
codegen_flags: <defaults>
</compile_context>

<pallas_src>
import jax
import jax.numpy as jnp
from jax.experimental import pallas as pl
from jax.experimental.pallas import tpu as pltpu


def _silu_kernel(x_ref, o_ref):
    x = x_ref[...].astype(jnp.float32)
    # sigmoid(x) = 0.5 * (tanh(x/2) + 1): one transcendental on the EUP.
    sig = 0.5 * (jnp.tanh(0.5 * x) + 1.0)
    o_ref[...] = (x * sig).astype(o_ref.dtype)


def _silu_jax(x: jnp.ndarray) -> jnp.ndarray:
    """Plain-JAX fallback for tiny inputs / ragged tails (XLA fuses this)."""
    xf = x.astype(jnp.float32)
    return (xf * jax.nn.sigmoid(xf)).astype(x.dtype)


def silu(
    x: jnp.ndarray,
    *,
    target_block_bytes: int = 4 * 1024 * 1024,
    min_pallas_bytes: int = 1 * 1024 * 1024,
) -> jnp.ndarray:
    """Elementwise SiLU. Accepts any shape; computes in a flat lane-dense 2-D layout."""
    orig_shape = x.shape
    orig_dtype = x.dtype
    n = x.size
    if n == 0:
        return x

    itemsize = jnp.dtype(orig_dtype).itemsize

    # Single-block regime: pallas_call dispatch + pipeline setup with zero
    # pipelining benefit.  Let XLA fuse it.
    if n * itemsize < min_pallas_bytes:
        return _silu_jax(x)

    LANE, SUB = 128, 8

    # ---- Layout: 128-aligned prefix as a lane-dense (R, W) slab ------------
    n_aligned = (n // LANE) * LANE
    tail_n = n - n_aligned
    if n_aligned == 0:
        return _silu_jax(x)

    x_flat = jnp.ravel(x)                     # contiguous -> free bitcast
    x_main = x_flat[:n_aligned] if tail_n else x_flat

    # Widest lane dim (multiple of 128) dividing the prefix -> unmasked vst.
    W = LANE
    for cand in (2048, 1024, 512, 256, 128):
        if n_aligned % cand == 0:
            W = cand
            break
    R = n_aligned // W
    x2d = x_main.reshape(R, W)

    # ---- Row tile: ~target_block_bytes per buffer, multiple of 8 rows ------
    block_bytes = min(target_block_bytes, 8 * 1024 * 1024)   # stay in VMEM budget
    target_rows = max(SUB, (block_bytes // (W * itemsize)) // SUB * SUB)
    if R <= target_rows:
        tr = R                 # single block covering the full row dim (legal: full dim)
    else:
        tr = target_rows       # multiple of 8; partial last block handled by Pallas
    grid = (pl.cdiv(R, tr),)

    # Double-buffered in + out: VMEM use ~= 4 x tile bytes (<= 32 MiB with
    # 8 MiB tiles); 40 MiB scoped limit leaves headroom even on v7x (64 MiB).
    vmem_limit = 40 * 1024 * 1024

    out2d = pl.pallas_call(
        _silu_kernel,
        out_shape=jax.ShapeDtypeStruct((R, W), orig_dtype),
        grid_spec=pltpu.PrefetchScalarGridSpec(
            num_scalar_prefetch=0,
            grid=grid,
            in_specs=[pl.BlockSpec((tr, W), lambda i: (i, 0))],
            out_specs=pl.BlockSpec((tr, W), lambda i: (i, 0)),
        ),
        compiler_params=pltpu.CompilerParams(
            dimension_semantics=("parallel",),
            vmem_limit_bytes=vmem_limit,
        ),
    )(x2d)

    out_flat = out2d.reshape(-1)
    if tail_n:
        # <128-element tail: plain JAX, fused with the concatenate.
        tail_out = _silu_jax(x_flat[n_aligned:])
        out_flat = jnp.concatenate([out_flat, tail_out])
    return out_flat.reshape(orig_shape)


if __name__ == "__main__":
    key = jax.random.PRNGKey(0)

    def ref_silu(v):
        return v * jax.nn.sigmoid(v)

    # 1) NCHW like PyTorch conv activations (small -> XLA fast path).
    x = jax.random.normal(key, (2, 4, 16, 16), dtype=jnp.float32)
    y = silu(x)
    jax.block_until_ready(y)
    assert y.shape == x.shape and y.dtype == x.dtype
    assert jnp.allclose(y, ref_silu(x), atol=1e-5, rtol=1e-5)

    # 2) Same input forced through the Pallas kernel (aligned, single block).
    y_p = silu(x, min_pallas_bytes=0)
    jax.block_until_ready(y_p)
    assert y_p.shape == x.shape and y_p.dtype == x.dtype
    assert jnp.allclose(y_p, ref_silu(x), atol=1e-5, rtol=1e-5)

    # 3) 128-aligned but not 1024-aligned, R not a multiple of 8.
    x2 = jax.random.normal(jax.random.PRNGKey(1), (2, 4, 16, 17), dtype=jnp.float32)
    y2 = silu(x2, min_pallas_bytes=0)
    jax.block_until_ready(y2)
    assert y2.shape == x2.shape and y2.dtype == x2.dtype
    assert jnp.allclose(y2, ref_silu(x2), atol=1e-5, rtol=1e-5)

    # 4) Ragged size: Pallas on the aligned prefix + plain-JAX tail.
    x3 = jax.random.normal(jax.random.PRNGKey(2), (1, 1300), dtype=jnp.float32)
    y3 = silu(x3, min_pallas_bytes=0)
    jax.block_until_ready(y3)
    assert y3.shape == x3.shape and y3.dtype == x3.dtype
    assert jnp.allclose(y3, ref_silu(x3), atol=1e-5, rtol=1e-5)

    print("KERNEL_OK")
</pallas_src>

<mosaic_0001>
module attributes {stable_mosaic.version = 11 : i64} {
  func.func @_silu_kernel(%arg0: i32, %arg1: memref<1x2048xf32, #tpu.memory_space<vmem>>, %arg2: memref<1x2048xf32, #tpu.memory_space<vmem>>) attributes {dimension_semantics = [#tpu.dimension_semantics<parallel>], iteration_bounds = array<i64: 1>, scalar_prefetch = 0 : i64, scratch_operands = 0 : i64, tpu.core_type = #tpu.core_type<tc>, window_params = [{transform_indices = @transform_0, window_bounds = array<i64: 1, 2048>}, {transform_indices = @transform_1, window_bounds = array<i64: 1, 2048>}]} {
    %c0 = arith.constant 0 : index
    %c0_0 = arith.constant 0 : index
    %0 = vector.load %arg1[%c0, %c0_0] : memref<1x2048xf32, #tpu.memory_space<vmem>>, vector<1x2048xf32>
    %cst = arith.constant 5.000000e-01 : f32
    %1 = vector.broadcast %cst : f32 to vector<1x2048xf32>
    %2 = arith.mulf %1, %0 : vector<1x2048xf32>
    %3 = math.tanh %2 : vector<1x2048xf32>
    %cst_1 = arith.constant 1.000000e+00 : f32
    %4 = vector.broadcast %cst_1 : f32 to vector<1x2048xf32>
    %5 = arith.addf %3, %4 : vector<1x2048xf32>
    %cst_2 = arith.constant 5.000000e-01 : f32
    %6 = vector.broadcast %cst_2 : f32 to vector<1x2048xf32>
    %7 = arith.mulf %6, %5 : vector<1x2048xf32>
    %8 = arith.mulf %0, %7 : vector<1x2048xf32>
    %c0_3 = arith.constant 0 : index
    %c0_4 = arith.constant 0 : index
    %9 = vector.load %arg2[%c0_3, %c0_4] : memref<1x2048xf32, #tpu.memory_space<vmem>>, vector<1x2048xf32>
    tpu.vector_store %arg2[%c0_3, %c0_4], %8 {strides = array<i32>} : memref<1x2048xf32, #tpu.memory_space<vmem>>, vector<1x2048xf32>,
    return
  }
  func.func @transform_0(%arg0: i32) -> (i32, i32) {
    %c0_i32 = arith.constant 0 : i32
    %c0_i32_0 = arith.constant 0 : i32
    return %arg0, %c0_i32 : i32, i32
  }
  func.func @transform_1(%arg0: i32) -> (i32, i32) {
    %c0_i32 = arith.constant 0 : i32
    %c0_i32_0 = arith.constant 0 : i32
    return %arg0, %c0_i32 : i32, i32
  }
}

</mosaic_0001>

<bundles_post_ra>
// kernel: tpu_custom_call.1
= control target key start
LH: loop header
LB: loop body
LE: loop exit
PB: predicated region body
PF: predicated region fallthrough
CT: control target
= control target key end

     0   :  { %6 = vsyncpa [#allocation3], 0  ;;  %s140_s0 = inlined_call_operand.hbm [shape: f32[1,2048], index: 0, kind: input, shape index: {}]   ;;  %s141_s1 = inlined_call_operand.hbm [shape: f32[1,2048], index: 1, kind: output, shape index: {}]  }
   0x1   :  { %7 = vsyncpa [#allocation4], 0  ;;  %s104_s6 = smov [#allocation2]   ;;  %s56_s10 = scalar_lea.hbm %s140_s0, 256 }
   0x2   :  { %s14_s7 = sshll.u32 %s104_s6, 4  ;;  %p57_p0 = scmp.ne.s32.totalorder %s140_s0, %s56_s10  ;;  %s15_s7 = int_to_ptr.vmem [resolvable:$true] %s14_s7 }
   0x3   :  { %p60_p1 = scmp.lt.u32.totalorder %s56_s10, %s140_s0 }
   0x5   :  { %p62_p2 = pnand %p60_p1, %p57_p0 }
   0x7   :  { %65 = shalt.err (!%p62_p2)
}
   0x8   :  { %s66_s15 = scalar_lea.vmem %s15_s7, 256  ;;  %p71_p4 = scmp.lt.s32.totalorder %s15_s7, %s15_s7 }
   0x9   :  { %p67_p3 = scmp.ne.s32.totalorder %s15_s7, %s66_s15  ;;  %p72_p5 = scmp.lt.s32.totalorder %s66_s15, %s66_s15 }
   0xb   :  { %p73_p6 = por %p72_p5, %p71_p4 }
   0xd   :  { %p74_p7 = pnand %p73_p6, %p67_p3 }
   0xf   :  { %77 = shalt.err (!%p74_p7)
}
  0x10   :  { %17 = dma.hbm_to_vmem [thread:$0]  %s140_s0, 256, %s15_s7, [#allocation3]  }
  0x11   :  { %100 = dma.done.wait [#allocation3], 256  }
  0x12   :  { %101 = vsyncadd [#allocation3], 4294967040  ;;  %v21_v0 = vld [vmem:[#allocation2] sm:$0xff]  ;;  %v22_v1 = vld [vmem:[#allocation2 + $0x8] sm:$0xff]  ;;  %s105_s18 = smov [#allocation5]  }
  0x13   :  { %v23_v2 = vmul.f32 0.5, %v21_v0  ;;  %v24_v3 = vmul.f32 0.5, %v22_v1  ;;  %s41_s19 = sshll.u32 %s105_s18, 4  ;;  %s42_s19 = int_to_ptr.vmem [resolvable:$true] %s41_s19 }
  0x14   :  { %s78_s0 = scalar_lea.vmem %s42_s19, 256  ;;  %p83_p9 = scmp.lt.s32.totalorder %s42_s19, %s42_s19 }
  0x15   :  { %52 = vtanh.f32 %v23_v2  ;;  %p79_p8 = scmp.ne.s32.totalorder %s42_s19, %s78_s0  ;;  %p84_p10 = scmp.lt.s32.totalorder %s78_s0, %s78_s0 }
  0x16   :  { %54 = vtanh.f32 %v24_v3 }
  0x17   :  { %p85_p11 = por %p84_p10, %p83_p9 }
  0x19   :  { %p86_p12 = pnand %p85_p11, %p79_p8 }
  0x1f   :  { %v53_v4 = vpop.eup %52 }
  0x20   :  { %v55_v5 = vpop.eup %54  ;;  %v27_v6 = vadd.f32 1.0, %v53_v4 }
  0x21   :  { %v28_v7 = vadd.f32 1.0, %v55_v5 }
  0x22   :  { %v29_v8 = vmul.f32 0.5, %v27_v6 }
  0x23   :  { %v30_v9 = vmul.f32 0.5, %v28_v7 }
  0x24   :  { %v31_v10 = vmul.f32 %v29_v8, %v21_v0 }
  0x25   :  { %v32_v11 = vmul.f32 %v30_v9, %v22_v1 }
  0x26   :  { %33 = vst [vmem:[#allocation5] sm:$0xff] %v31_v10 }
  0x27   :  { %34 = vst [vmem:[#allocation5 + $0x8] sm:$0xff] %v32_v11 }
  0x28   :  { %89 = shalt.err (!%p86_p12)
}
  0x29   :  { %s90_s22 = scalar_lea.hbm %s141_s1, 256 }
  0x2a   :  { %p91_p13 = scmp.ne.s32.totalorder %s141_s1, %s90_s22  ;;  %p94_p0 = scmp.lt.u32.totalorder %s90_s22, %s141_s1 }
  0x2c   :  { %p96_p1 = pnand %p94_p0, %p91_p13 }
  0x2e   :  { %99 = shalt.err (!%p96_p1)
}
  0x2f   :  { %44 = dma.vmem_to_hbm [thread:$0]  %s42_s19, 256, %s141_s1, [#allocation4]  }
  0x30   :  { %102 = dma.done.wait [#allocation4], 256  }
  0x31   :  { %103 = vsyncadd [#allocation4], 4294967040 }
  0x32   :  { %48 = vsyncpa [#allocation3], 1 }
  0x33   :  { %49 = vsyncpa [#allocation4], 1 }

</bundles_post_ra>
